<compile_context>
chip_gen: v7x
topology: tpu7x:2x2x1
jax: 0.10.0
libtpu: 0.0.40
codegen_flags: <defaults>
</compile_context>

<pallas_src>
import jax
import jax.numpy as jnp
from jax.experimental import pallas as pl
from jax.experimental.pallas import tpu as pltpu


def _recurrent_block_kernel(eps_ref, delta_ref, x_ref, o_ref):
    # eps / delta live in SMEM as (1, 1) scalars.
    eps = eps_ref[0, 0]
    delta = delta_ref[0, 0]
    o_ref[...] = jnp.minimum(jnp.floor(x_ref[...] * eps), delta)


def recurrent_block(dist, eps, delta, *, tile_rows=2048):
    """floor(dist * eps) clamped from above by delta, elementwise.

    dist: arbitrary-shape float array (e.g. NCHW).
    eps, delta: shape-(1,) float arrays (the learned scalars).
    """
    orig_shape = dist.shape
    dtype = dist.dtype
    total = dist.size
    lanes = 128

    # Flatten row-major; pad only up to the 128-lane requirement.
    flat = jnp.ravel(dist)
    rem = total % lanes
    if rem != 0:
        flat = jnp.pad(flat, (0, lanes - rem))
    n_rows = flat.size // lanes
    x2d = flat.reshape(n_rows, lanes)

    # Large lane-dense tile; clamp to the array when the array is small.
    # (tile_rows default is a multiple of 8, so ragged last blocks are legal.)
    tr = min(int(tile_rows), n_rows)
    if tr < n_rows and tr % 8 != 0:
        tr = max(8, (tr // 8) * 8)
    grid = (pl.cdiv(n_rows, tr),)

    # Scalars as (1,1) SMEM residents, in the compute dtype.
    eps2 = jnp.reshape(eps.astype(dtype), (1, 1))
    delta2 = jnp.reshape(delta.astype(dtype), (1, 1))

    # Double-buffered input + output footprint = 4 * block bytes.
    block_bytes = tr * lanes * x2d.dtype.itemsize
    vmem_need = 4 * block_bytes
    cp_kwargs = dict(dimension_semantics=("parallel",))
    if vmem_need > 12 * 1024 * 1024:
        cp_kwargs["vmem_limit_bytes"] = min(vmem_need + (8 << 20), 100 << 20)

    out2d = pl.pallas_call(
        _recurrent_block_kernel,
        out_shape=jax.ShapeDtypeStruct((n_rows, lanes), x2d.dtype),
        grid_spec=pl.GridSpec(
            grid=grid,
            in_specs=[
                pl.BlockSpec(memory_space=pltpu.MemorySpace.SMEM),   # eps
                pl.BlockSpec(memory_space=pltpu.MemorySpace.SMEM),   # delta
                pl.BlockSpec((tr, lanes), lambda i: (i, 0)),         # dist tile
            ],
            out_specs=pl.BlockSpec((tr, lanes), lambda i: (i, 0)),
        ),
        input_output_aliases={2: 0},  # write result in place of the dist slab
        compiler_params=pltpu.CompilerParams(**cp_kwargs),
    )(eps2, delta2, x2d)

    out = out2d.reshape(-1)[:total].reshape(orig_shape)
    return out


if __name__ == "__main__":
    key = jax.random.PRNGKey(0)
    # Small NCHW input consistent with a conv-style pipeline.
    x = jax.random.normal(key, (2, 4, 16, 16), dtype=jnp.float32)

    # Deterministic parameter init, matching torch.nn.init.constant_.
    eps = jnp.full((1,), 10.0, dtype=jnp.float32)
    delta = jnp.full((1,), 10.0, dtype=jnp.float32)

    out = recurrent_block(x, eps, delta)
    out = jax.block_until_ready(out)

    # Reference check in plain JAX (same semantics as the PyTorch forward).
    ref = jnp.floor(x * eps[0])
    ref = jnp.where(ref > delta[0], delta[0], ref)
    assert out.shape == x.shape
    assert out.dtype == x.dtype
    assert jnp.allclose(out, ref), "mismatch vs reference"

    print("KERNEL_OK")
</pallas_src>

<mosaic_0001>
module attributes {stable_mosaic.version = 11 : i64} {
  func.func @_recurrent_block_kernel(%arg0: i32, %arg1: memref<1x1xf32, #tpu.memory_space<smem>>, %arg2: memref<1x1xf32, #tpu.memory_space<smem>>, %arg3: memref<16x128xf32, #tpu.memory_space<vmem>>, %arg4: memref<16x128xf32, #tpu.memory_space<vmem>>) attributes {dimension_semantics = [#tpu.dimension_semantics<parallel>], iteration_bounds = array<i64: 1>, scalar_prefetch = 0 : i64, scratch_operands = 0 : i64, tpu.core_type = #tpu.core_type<tc>, window_params = [{transform_indices = @transform_0, window_bounds = array<i64: 1, 1>}, {transform_indices = @transform_1, window_bounds = array<i64: 1, 1>}, {transform_indices = @transform_2, window_bounds = array<i64: 16, 128>}, {transform_indices = @transform_3, window_bounds = array<i64: 16, 128>}]} {
    %c0 = arith.constant 0 : index
    %c0_0 = arith.constant 0 : index
    %0 = memref.load %arg1[%c0, %c0_0] : memref<1x1xf32, #tpu.memory_space<smem>>
    %c0_1 = arith.constant 0 : index
    %c0_2 = arith.constant 0 : index
    %1 = memref.load %arg2[%c0_1, %c0_2] : memref<1x1xf32, #tpu.memory_space<smem>>
    %c0_3 = arith.constant 0 : index
    %c0_4 = arith.constant 0 : index
    %2 = vector.load %arg3[%c0_3, %c0_4] : memref<16x128xf32, #tpu.memory_space<vmem>>, vector<16x128xf32>
    %3 = vector.broadcast %0 : f32 to vector<16x128xf32>
    %4 = arith.mulf %2, %3 : vector<16x128xf32>
    %5 = math.floor %4 : vector<16x128xf32>
    %6 = vector.broadcast %1 : f32 to vector<16x128xf32>
    %7 = arith.minimumf %5, %6 : vector<16x128xf32>
    %c0_5 = arith.constant 0 : index
    %c0_6 = arith.constant 0 : index
    %8 = vector.load %arg4[%c0_5, %c0_6] : memref<16x128xf32, #tpu.memory_space<vmem>>, vector<16x128xf32>
    tpu.vector_store %arg4[%c0_5, %c0_6], %7 {strides = array<i32>} : memref<16x128xf32, #tpu.memory_space<vmem>>, vector<16x128xf32>,
    return
  }
  func.func @transform_0(%arg0: i32) -> (i32, i32) {
    %c0_i32 = arith.constant 0 : i32
    %c0_i32_0 = arith.constant 0 : i32
    %c0_i32_1 = arith.constant 0 : i32
    return %c0_i32, %c0_i32_0 : i32, i32
  }
  func.func @transform_1(%arg0: i32) -> (i32, i32) {
    %c0_i32 = arith.constant 0 : i32
    %c0_i32_0 = arith.constant 0 : i32
    %c0_i32_1 = arith.constant 0 : i32
    return %c0_i32, %c0_i32_0 : i32, i32
  }
  func.func @transform_2(%arg0: i32) -> (i32, i32) {
    %c0_i32 = arith.constant 0 : i32
    %c0_i32_0 = arith.constant 0 : i32
    return %arg0, %c0_i32 : i32, i32
  }
  func.func @transform_3(%arg0: i32) -> (i32, i32) {
    %c0_i32 = arith.constant 0 : i32
    %c0_i32_0 = arith.constant 0 : i32
    return %arg0, %c0_i32 : i32, i32
  }
}

</mosaic_0001>

<bundles_post_ra>
// kernel: tpu_custom_call.1
= control target key start
LH: loop header
LB: loop body
LE: loop exit
PB: predicated region body
PF: predicated region fallthrough
CT: control target
= control target key end

     0   :  { %10 = vsyncpa [#allocation5], 0  ;;  %s174_s0 = inlined_call_operand.<no memory space> [shape: f32[1,1], index: 0, kind: input, shape index: {}]   ;;  %s175_s1 = inlined_call_operand.<no memory space> [shape: f32[1,1], index: 1, kind: input, shape index: {}]   ;;  %s176_s2 = inlined_call_operand.hbm [shape: f32[16,128], index: 2, kind: input, shape index: {}, may-alias: {2,3}]   ;;  %s177_s3 = inlined_call_operand.hbm [shape: f32[16,128], index: 3, kind: output, shape index: {}, may-alias: {2,3}]  }
   0x1   :  { %11 = vsyncpa [#allocation6], 0  ;;  %s114_s12 = smov [#allocation4]   ;;  %s66_s16 = scalar_lea.hbm %s176_s2, 256 }
   0x2   :  { %s21_s13 = sshll.u32 %s114_s12, 4  ;;  %p67_p0 = scmp.ne.s32.totalorder %s176_s2, %s66_s16  ;;  %s22_s13 = int_to_ptr.vmem [resolvable:$true] %s21_s13 }
   0x3   :  { %p70_p1 = scmp.lt.u32.totalorder %s66_s16, %s176_s2 }
   0x5   :  { %p72_p2 = pnand %p70_p1, %p67_p0 }
   0x7   :  { %75 = shalt.err (!%p72_p2)
}
   0x8   :  { %s76_s21 = scalar_lea.vmem %s22_s13, 256  ;;  %p81_p4 = scmp.lt.s32.totalorder %s22_s13, %s22_s13 }
   0x9   :  { %p77_p3 = scmp.ne.s32.totalorder %s22_s13, %s76_s21  ;;  %p82_p5 = scmp.lt.s32.totalorder %s76_s21, %s76_s21 }
   0xb   :  { %p83_p6 = por %p82_p5, %p81_p4 }
   0xd   :  { %p84_p7 = pnand %p83_p6, %p77_p3 }
   0xf   :  { %87 = shalt.err (!%p84_p7)
}
  0x10   :  { %s115_s22 = smov 128   ;;  %s116_s23 = smov 8  }
  0x11   :  { %27 = dma.hbm_to_vmem [thread:$0]  %s176_s2, 256, %s22_s13, [#allocation5], %s115_s22, %s115_s22, %s116_s23  }
  0x12   :  { %110 = dma.done.wait [#allocation5], 256  }
  0x13   :  { %111 = vsyncadd [#allocation5], 4294967040  ;;  %v35_v0 = vstv %s174_s0  ;;  %v33_v1 = vld [vmem:[#allocation4] sm:$0xff]  ;;  %v34_v2 = vld [vmem:[#allocation4 + $0x8] sm:$0xff]  ;;  %v40_v5 = vstv %s175_s1  ;;  %s117_s30 = smov [#allocation7]  }
  0x14   :  { %v36_v3 = vmul.f32 %v35_v0, %v33_v1  ;;  %v37_v4 = vmul.f32 %v35_v0, %v34_v2  ;;  %s50_s4 = sshll.u32 %s117_s30, 4  ;;  %s51_s4 = int_to_ptr.vmem [resolvable:$true] %s50_s4 }
  0x15   :  { %s88_s2 = scalar_lea.vmem %s51_s4, 256  ;;  %p93_p9 = scmp.lt.s32.totalorder %s51_s4, %s51_s4 }
  0x16   :  { %v38_v6 = vfloor.f32 %v36_v3  ;;  %v39_v7 = vfloor.f32 %v37_v4  ;;  %p89_p8 = scmp.ne.s32.totalorder %s51_s4, %s88_s2  ;;  %p94_p10 = scmp.lt.s32.totalorder %s88_s2, %s88_s2 }
  0x18   :  { %v41_v8 = vmin.f32 %v38_v6, %v40_v5  ;;  %v42_v9 = vmin.f32 %v39_v7, %v40_v5  ;;  %p95_p11 = por %p94_p10, %p93_p9 }
  0x1a   :  { %43 = vst [vmem:[#allocation7] sm:$0xff] %v41_v8  ;;  %44 = vst [vmem:[#allocation7 + $0x8] sm:$0xff] %v42_v9  ;;  %p96_p12 = pnand %p95_p11, %p89_p8 }
  0x1c   :  { %99 = shalt.err (!%p96_p12)
}
  0x1d   :  { %s100_s1 = scalar_lea.hbm %s177_s3, 256 }
  0x1e   :  { %p101_p13 = scmp.ne.s32.totalorder %s177_s3, %s100_s1  ;;  %p104_p0 = scmp.lt.u32.totalorder %s100_s1, %s177_s3 }
  0x20   :  { %p106_p1 = pnand %p104_p0, %p101_p13 }
  0x22   :  { %109 = shalt.err (!%p106_p1)
}
  0x23   :  { %56 = dma.vmem_to_hbm [thread:$0]  %s51_s4, 256, %s177_s3, [#allocation6], %s115_s22, %s115_s22, %s116_s23  }
  0x24   :  { %112 = dma.done.wait [#allocation6], 256  }
  0x25   :  { %113 = vsyncadd [#allocation6], 4294967040 }
  0x26   :  { %60 = vsyncpa [#allocation5], 1 }
  0x27   :  { %61 = vsyncpa [#allocation6], 1 }

</bundles_post_ra>
